<compile_context>
chip_gen: v5e
topology: v5e:2x2
jax: 0.10.0
libtpu: 0.0.40
codegen_flags: <defaults>
</compile_context>

<pallas_src>
import math

import jax
import jax.numpy as jnp
from jax.experimental import pallas as pl
from jax.experimental.pallas import tpu as pltpu


def _round_up(n, m):
    return (n + m - 1) // m * m


def postpool_kernel(x_ref, wt_ref, b_ref, out_ref):
    """One row tile: out = x @ W_t + b (W_t pre-transposed+lane-padded, b is f32)."""
    y = jnp.dot(x_ref[...], wt_ref[...], preferred_element_type=jnp.float32)
    out_ref[...] = (y + b_ref[...]).astype(out_ref.dtype)


def prepare_postpool_params(params, *, compute_dtype=None):
    """One-time host-side prep (call at init/param-load time, NOT per forward).

    params: {"w": (2*c_dim, hid_dim)  [PyTorch nn.Linear layout], "b": (2*c_dim,)}
    Returns pre-transposed weight (hid_dim, Np) with Np = 2*c_dim rounded up to a
    multiple of 128 (lane-dense output), plus the bias pre-cast to f32 (1, Np).
    """
    w = jnp.asarray(params["w"])                      # (2C, H)
    b = jnp.asarray(params["b"])                      # (2C,)
    two_c, hid_dim = w.shape
    dtype = jnp.dtype(compute_dtype) if compute_dtype is not None else w.dtype

    n_pad = _round_up(max(two_c, 128), 128)           # lane-dense output width
    w_t = jnp.zeros((hid_dim, n_pad), dtype).at[:, :two_c].set(w.astype(dtype).T)
    b_p = jnp.zeros((1, n_pad), jnp.float32).at[:, :two_c].set(b.astype(jnp.float32))
    return {"w_t": w_t, "b": b_p, "hid_dim": hid_dim, "two_c": two_c}


def postpool_forward(x, prepped, *, block_b=512):
    """PostPool.forward: returns (mean, logvar), each with last dim c_dim.

    x: (..., hid_dim); leading dims flattened into one batch axis for the kernel.
    prepped: output of prepare_postpool_params (weight already transposed/padded).
    """
    w_t = prepped["w_t"]
    b = prepped["b"]
    hid_dim = prepped["hid_dim"]
    two_c = prepped["two_c"]
    c_dim = two_c // 2
    n_pad = w_t.shape[1]

    *lead, h = x.shape
    assert h == hid_dim, f"last dim {h} != hid_dim {hid_dim}"

    x2 = x.reshape(-1, hid_dim)
    B = x2.shape[0]

    if B == 0:                                        # empty-batch guard
        z = jnp.zeros((*lead, c_dim), x.dtype)
        return z, z

    itemsize = jnp.dtype(x.dtype).itemsize
    w_bytes = w_t.size * jnp.dtype(w_t.dtype).itemsize
    b_bytes = b.size * 4

    def vmem_bytes(t):
        # double-buffered x and out tiles + (at most double-buffered) weight/bias
        return (2 * t * hid_dim * itemsize
                + 2 * t * n_pad * itemsize
                + 2 * (w_bytes + b_bytes))

    VMEM_BUDGET = 48 * 1024 * 1024                    # safe on v7x (64 MiB physical)
    if B <= block_b:
        tm = B                                        # single tile == full array
    else:
        tm = block_b                                  # multiple of 128 by default
        while tm > 128 and vmem_bytes(tm) > VMEM_BUDGET:
            tm //= 2

    grid = (pl.cdiv(B, tm),)                          # last tile may overhang:
    # Pallas masks the out-of-bounds rows (garbage input rows only produce
    # garbage output rows, whose stores are dropped) -> no host-side jnp.pad.

    # Resident (constant-index) weight/bias: drop to a single buffer only when
    # they are big enough that the extra VMEM copy matters (v7x pressure).
    if w_bytes > (8 << 20):
        w_spec = pl.BlockSpec((hid_dim, n_pad), lambda i: (0, 0),
                              pipeline_mode=pl.Buffered(1))
        b_spec = pl.BlockSpec((1, n_pad), lambda i: (0, 0),
                              pipeline_mode=pl.Buffered(1))
    else:
        w_spec = pl.BlockSpec((hid_dim, n_pad), lambda i: (0, 0))
        b_spec = pl.BlockSpec((1, n_pad), lambda i: (0, 0))

    cost = pl.CostEstimate(
        flops=2 * B * hid_dim * n_pad,
        transcendentals=0,
        bytes_accessed=(B * hid_dim * itemsize + B * n_pad * itemsize
                        + w_bytes + b_bytes),
    )

    out = pl.pallas_call(
        postpool_kernel,
        out_shape=jax.ShapeDtypeStruct((B, n_pad), x.dtype),
        grid_spec=pltpu.PrefetchScalarGridSpec(
            num_scalar_prefetch=0,
            grid=grid,
            in_specs=[
                pl.BlockSpec((tm, hid_dim), lambda i: (i, 0)),   # x row tile
                w_spec,                                          # W_t (resident)
                b_spec,                                          # bias f32 (resident)
            ],
            out_specs=pl.BlockSpec((tm, n_pad), lambda i: (i, 0)),
        ),
        compiler_params=pltpu.CompilerParams(
            dimension_semantics=("parallel",),        # shard row tiles across TCs
            vmem_limit_bytes=int(min(max(2 * vmem_bytes(tm), 32 << 20), 56 << 20)),
        ),
        cost_estimate=cost,
    )(x2, w_t, b)

    # torch.chunk(x, 2, -1): zero-cost slices of the lane-dense slab.
    # TODO(synk): if c_dim were a multiple of 128, emit mean/logvar as two
    # kernel outputs instead of slab + slices.
    out = out[:, :two_c].reshape(*lead, two_c)
    mean = out[..., :c_dim]
    logvar = out[..., c_dim:]
    return mean, logvar


def init_params(key, hid_dim, c_dim, dtype=jnp.float32):
    """Deterministic init mimicking nn.Linear default (uniform +/- 1/sqrt(fan_in))."""
    k_w, k_b = jax.random.split(key, 2)
    bound = 1.0 / math.sqrt(hid_dim)
    w = jax.random.uniform(k_w, (2 * c_dim, hid_dim), dtype=dtype,
                           minval=-bound, maxval=bound)
    b = jax.random.uniform(k_b, (2 * c_dim,), dtype=dtype,
                           minval=-bound, maxval=bound)
    return {"w": w, "b": b}


def postpool_reference(x, params):
    """Pure-JAX reference matching the PyTorch forward."""
    y = x @ params["w"].T + params["b"]
    c_dim = params["w"].shape[0] // 2
    return y[..., :c_dim], y[..., c_dim:]


if __name__ == "__main__":
    hid_dim = 32
    c_dim = 16
    batch, seq = 2, 8          # x: (2, 8, 32) -> mean/logvar: (2, 8, 16)

    key = jax.random.PRNGKey(0)
    k_par, k_x1, k_x2 = jax.random.split(key, 3)

    params = init_params(k_par, hid_dim, c_dim)
    prepped = prepare_postpool_params(params)        # one-time host-side prep

    x = jax.random.normal(k_x1, (batch, seq, hid_dim), dtype=jnp.float32)
    mean, logvar = postpool_forward(x, prepped)
    jax.block_until_ready((mean, logvar))

    mean_ref, logvar_ref = postpool_reference(x, params)
    assert mean.shape == (batch, seq, c_dim) and logvar.shape == (batch, seq, c_dim)
    assert jnp.allclose(mean, mean_ref, atol=1e-5, rtol=1e-5)
    assert jnp.allclose(logvar, logvar_ref, atol=1e-5, rtol=1e-5)

    # Odd leading shape (flattened batch not a multiple of 8) — still one full tile.
    x_odd = jax.random.normal(k_x2, (3, 7, hid_dim), dtype=jnp.float32)
    m2, lv2 = postpool_forward(x_odd, prepped)
    jax.block_until_ready((m2, lv2))
    m2_ref, lv2_ref = postpool_reference(x_odd, params)
    assert jnp.allclose(m2, m2_ref, atol=1e-5, rtol=1e-5)
    assert jnp.allclose(lv2, lv2_ref, atol=1e-5, rtol=1e-5)

    print("KERNEL_OK")
</pallas_src>

<mosaic_0001>
module attributes {stable_mosaic.version = 11 : i64} {
  func.func @postpool_kernel(%arg0: i32, %arg1: memref<16x32xf32, #tpu.memory_space<vmem>>, %arg2: memref<32x128xf32, #tpu.memory_space<vmem>>, %arg3: memref<1x128xf32, #tpu.memory_space<vmem>>, %arg4: memref<16x128xf32, #tpu.memory_space<vmem>>) attributes {dimension_semantics = [#tpu.dimension_semantics<parallel>], iteration_bounds = array<i64: 1>, scalar_prefetch = 0 : i64, scratch_operands = 0 : i64, tpu.core_type = #tpu.core_type<tc>, window_params = [{transform_indices = @transform_0, window_bounds = array<i64: 16, 32>}, {pipeline_mode = #tpu.pipeline_mode<synchronous>, transform_indices = @transform_1, window_bounds = array<i64: 32, 128>}, {pipeline_mode = #tpu.pipeline_mode<synchronous>, transform_indices = @transform_2, window_bounds = array<i64: 1, 128>}, {transform_indices = @transform_3, window_bounds = array<i64: 16, 128>}]} {
    %c0 = arith.constant 0 : index
    %c0_0 = arith.constant 0 : index
    %0 = vector.load %arg1[%c0, %c0_0] : memref<16x32xf32, #tpu.memory_space<vmem>>, vector<16x32xf32>
    %c0_1 = arith.constant 0 : index
    %c0_2 = arith.constant 0 : index
    %1 = vector.load %arg2[%c0_1, %c0_2] : memref<32x128xf32, #tpu.memory_space<vmem>>, vector<32x128xf32>
    %cst = arith.constant dense<0.000000e+00> : vector<16x128xf32>
    %2 = tpu.matmul %0, %1, %cst {dimension_numbers = #tpu.dot_dimension_numbers<[1], [0], [0], [1], [0, 0, 1, 1], [], []>} : vector<16x32xf32>, vector<32x128xf32>, vector<16x128xf32> -> vector<16x128xf32>
    %c0_3 = arith.constant 0 : index
    %c0_4 = arith.constant 0 : index
    %3 = vector.load %arg3[%c0_3, %c0_4] : memref<1x128xf32, #tpu.memory_space<vmem>>, vector<1x128xf32>
    %4 = vector.broadcast %3 : vector<1x128xf32> to vector<16x128xf32>
    %5 = arith.addf %2, %4 : vector<16x128xf32>
    %c0_5 = arith.constant 0 : index
    %c0_6 = arith.constant 0 : index
    %6 = vector.load %arg4[%c0_5, %c0_6] : memref<16x128xf32, #tpu.memory_space<vmem>>, vector<16x128xf32>
    tpu.vector_store %arg4[%c0_5, %c0_6], %5 {strides = array<i32>} : memref<16x128xf32, #tpu.memory_space<vmem>>, vector<16x128xf32>,
    return
  }
  func.func @transform_0(%arg0: i32) -> (i32, i32) {
    %c0_i32 = arith.constant 0 : i32
    %c0_i32_0 = arith.constant 0 : i32
    return %arg0, %c0_i32 : i32, i32
  }
  func.func @transform_1(%arg0: i32) -> (i32, i32) {
    %c0_i32 = arith.constant 0 : i32
    %c0_i32_0 = arith.constant 0 : i32
    %c0_i32_1 = arith.constant 0 : i32
    return %c0_i32, %c0_i32_0 : i32, i32
  }
  func.func @transform_2(%arg0: i32) -> (i32, i32) {
    %c0_i32 = arith.constant 0 : i32
    %c0_i32_0 = arith.constant 0 : i32
    %c0_i32_1 = arith.constant 0 : i32
    return %c0_i32, %c0_i32_0 : i32, i32
  }
  func.func @transform_3(%arg0: i32) -> (i32, i32) {
    %c0_i32 = arith.constant 0 : i32
    %c0_i32_0 = arith.constant 0 : i32
    return %arg0, %c0_i32 : i32, i32
  }
}

</mosaic_0001>

<bundles_post_ra>
// kernel: tpu_custom_call.1
= control target key start
LH: loop header
LB: loop body
LE: loop exit
PB: predicated region body
PF: predicated region fallthrough
CT: control target
= control target key end

     0   :  { %8 = vsyncpa [#allocation3], 0  ;;  %s245_s0 = inlined_call_operand.hbm [shape: f32[16,32], index: 0, kind: input, shape index: {}]   ;;  %s246_s1 = inlined_call_operand.hbm [shape: f32[32,128], index: 1, kind: input, shape index: {}]   ;;  %s247_s2 = inlined_call_operand.vmem [shape: f32[1,128], index: 2, kind: input, shape index: {}]   ;;  %s248_s3 = inlined_call_operand.hbm [shape: f32[16,128], index: 3, kind: output, shape index: {}]  }
   0x1   :  { %9 = vsyncpa [#allocation6], 0 }
   0x2   :  { %10 = vsyncpa [#allocation4], 0  ;;  %s15_s14 = sshll.u32 %s245_s0, 4  ;;  %s199_s15 = smov [#allocation2]   ;;  %s16_s14 = int_to_ptr.hbm [resolvable:$true] %s15_s14 }
   0x3   :  { %s17_s16 = sshll.u32 %s199_s15, 4  ;;  %s28_s19 = sshll.u32 %s246_s1, 4  ;;  %s18_s16 = int_to_ptr.vmem [resolvable:$true] %s17_s16  ;;  %s29_s19 = int_to_ptr.hbm [resolvable:$true] %s28_s19 }
   0x4   :  { %s200_s20 = smov 128   ;;  %s201_s21 = smov 8  }
   0x5   :  { %23 = dma.hbm_to_vmem [thread:$0]  %s16_s14, 256, %s18_s16, [#allocation3], %s200_s20, %s200_s20, %s201_s21  }
   0x6   :  { %s202_s22 = smov [#allocation5]  }
   0x7   :  { %s30_s23 = sshll.u32 %s202_s22, 4  ;;  %s31_s23 = int_to_ptr.vmem [resolvable:$true] %s30_s23 }
   0x8   :  { %36 = dma.hbm_to_vmem [thread:$0]  %s29_s19, 512, %s31_s23, [#allocation6], %s200_s20, %s200_s20, %s201_s21  }
   0x9   :  { %193 = dma.done.wait [#allocation3], 256  }
   0xa   :  { %194 = vsyncadd [#allocation3], 4294967040 }
   0xb   :  { %195 = dma.done.wait [#allocation6], 512  }
   0xc   :  { %196 = vsyncadd [#allocation6], 4294966784  ;;  %v52_v0 = vld [vmem:[#allocation5 + $0x18] sm:$0xff]  ;;  %v51_v1 = vld [vmem:[#allocation5 + $0x10] sm:$0xff]  ;;  %vm57_vm0 = vcmask 261120   ;;  %s203_s24 = smov [#allocation7]  }
   0xd   :  { %76 = vmatpush.msra.mxu0 %v52_v0  ;;  %111 = vmatpush.msra.mxu1 %v52_v0  ;;  %v50_v2 = vld [vmem:[#allocation5 + $0x8] sm:$0xff]  ;;  %v49_v3 = vld [vmem:[#allocation5] sm:$0xff]  ;;  %v47_v4 = vld [vmem:[#allocation2] sm:$0xff]  ;;  %s93_s25 = sshll.u32 %s203_s24, 4  ;;  %s95_s28 = sshll.u32 %s248_s3, 4  ;;  %s94_s25 = int_to_ptr.vmem [resolvable:$true] %s93_s25  ;;  %s96_s28 = int_to_ptr.hbm [resolvable:$true] %s95_s28 }
   0xe   :  { %v48_v5 = vld [vmem:[#allocation2 + $0x8] sm:$0xff]  ;;  %v120_v6 = vld [vmem:[%s247_s2] ss:$0 sm:$0xff] }
   0xf   :  { %77 = vmatpush.msra.mxu0 %v51_v1  ;;  %112 = vmatpush.msra.mxu1 %v51_v1 }
  0x11   :  { %78 = vmatpush.msra.mxu0 %v50_v2  ;;  %113 = vmatpush.msra.mxu1 %v50_v2 }
  0x13   :  { %79 = vmatpush.msra.mxu0 %v49_v3  ;;  %114 = vmatpush.msra.mxu1 %v49_v3 }
  0x14   :  { %109 = vmatmul.msk.f32.vlgmr.msra.gmra.mxu0 %vm57_vm0, %v47_v4  ;;  %110 = vmatmul.msk.f32.vlgmr.msra.gmra.mxu1 %vm57_vm0, %v48_v5 }
  0x91   :  { %v81_v7 = vpop.f32.mrf.mxu0  ;;  %v84_v8 = vpop.f32.mrf.mxu1 }
  0x92   :  { %v82_v9 = vadd.f32 %v120_v6, %v81_v7  ;;  %v85_v10 = vadd.f32 %v120_v6, %v84_v8 }
  0x94   :  { %87 = vst [vmem:[#allocation7] sm:$0xff] %v82_v9 }
  0x95   :  { %88 = vst [vmem:[#allocation7 + $0x8] sm:$0xff] %v85_v10 }
  0x96   :  { %101 = dma.vmem_to_hbm [thread:$0]  %s94_s25, 256, %s96_s28, [#allocation4], %s200_s20, %s200_s20, %s201_s21  }
  0x97   :  { %197 = dma.done.wait [#allocation4], 256  }
  0x98   :  { %198 = vsyncadd [#allocation4], 4294967040 }
  0x99   :  { %106 = vsyncpa [#allocation3], 1 }
  0x9a   :  { %107 = vsyncpa [#allocation6], 1 }
  0x9b   :  { %108 = vsyncpa [#allocation4], 1 }

</bundles_post_ra>
